<compile_context>
chip_gen: v5e
topology: v5e:2x2
jax: 0.10.0
libtpu: 0.0.40
codegen_flags: <defaults>
</compile_context>

<pallas_src>
import jax
import jax.numpy as jnp
from jax.experimental import pallas as pl
from jax.experimental.pallas import tpu as pltpu


def mlp_kernel(x_ref, w1_ref, b1_ref, w2_ref, b2_ref, o_ref):
    # hidden = sigmoid(x @ W1 + b1): bf16 MXU operands (cast in-kernel),
    # f32 accumulation, f32 bias add + sigmoid (EUP).
    x_bf16 = x_ref[...].astype(jnp.bfloat16)
    h = jnp.dot(x_bf16, w1_ref[...], preferred_element_type=jnp.float32)
    h = h + b1_ref[...]                      # (Bt,128) + (1,128) broadcast, f32
    h = jax.nn.sigmoid(h)
    # out = hidden @ W2 + b2 (output lanes padded to 128 -> unmasked store)
    out = jnp.dot(h.astype(jnp.bfloat16), w2_ref[...],
                  preferred_element_type=jnp.float32)
    out = out + b2_ref[...]                  # (Bt,128) + (1,128) broadcast, f32
    o_ref[...] = out.astype(o_ref.dtype)


def _round_up(n, m):
    return ((n + m - 1) // m) * m


def mlp_forward(x, w1, b1, w2, b2, *, batch_tile=1024, no_grid_max_batch=256,
                return_padded=False):
    """x:(B,784) f32, w1:(784,128), b1:(128,), w2:(128,10), b2:(10,) -> (B,10) f32.

    If return_padded=True, returns the (B,128) lane-padded output slab
    (columns 10..127 are exact zeros) so a downstream consumer can skip the
    slicing pass.
    """
    B, K = x.shape
    H = w1.shape[1]
    O = w2.shape[1]
    O_pad = _round_up(O, 128)   # 10 -> 128

    # x stays f32 and unpadded — cast to bf16 happens inside the kernel.
    x = x.astype(jnp.float32)
    # Weights are tiny; one-time bf16 cast (and 10->128 pad for W2) is cheap.
    w1_p = w1.astype(jnp.bfloat16)
    w2_p = jnp.pad(w2.astype(jnp.bfloat16), ((0, 0), (0, O_pad - O)))
    b1_p = b1.reshape(1, H).astype(jnp.float32)
    b2_p = jnp.pad(b2.reshape(1, O).astype(jnp.float32), ((0, 0), (0, O_pad - O)))

    if B <= no_grid_max_batch:
        # Small batch: no grid at all — whole arrays resident in VMEM, no
        # pipeline machinery / per-step overhead (latency-bound regime).
        out_padded = pl.pallas_call(
            mlp_kernel,
            out_shape=jax.ShapeDtypeStruct((B, O_pad), jnp.float32),
            in_specs=[pl.BlockSpec(memory_space=pltpu.MemorySpace.VMEM)] * 5,
            out_specs=pl.BlockSpec(memory_space=pltpu.MemorySpace.VMEM),
        )(x, w1_p, b1_p, w2_p, b2_p)
        return out_padded if return_padded else out_padded[:, :O]

    # Large batch: tile the batch axis (no wrapper-side batch pad — Pallas
    # masks the ragged last block). Weights/biases stay VMEM-resident (same
    # block every grid step). Batch axis "parallel" for megacore (v7x 2 TCs).
    n_tiles = pl.cdiv(B, batch_tile)
    if n_tiles < 2:
        # Ensure >= 2 parallel steps so both v7x TensorCores get work.
        batch_tile = _round_up(pl.cdiv(B, 2), 8)
        n_tiles = pl.cdiv(B, batch_tile)
    grid = (n_tiles,)

    cost = pl.CostEstimate(
        flops=2 * B * (K * H + H * O_pad),
        transcendentals=B * H,
        bytes_accessed=(4 * B * K            # x (f32 read)
                        + 4 * B * O_pad      # out (f32 write)
                        + 2 * (K * H + H * O_pad)   # bf16 weights
                        + 4 * (H + O_pad)))  # f32 biases

    out_padded = pl.pallas_call(
        mlp_kernel,
        out_shape=jax.ShapeDtypeStruct((B, O_pad), jnp.float32),
        grid=grid,
        in_specs=[
            pl.BlockSpec((batch_tile, K), lambda i: (i, 0)),
            pl.BlockSpec((K, H), lambda i: (0, 0)),       # weight-stationary
            pl.BlockSpec((1, H), lambda i: (0, 0)),
            pl.BlockSpec((H, O_pad), lambda i: (0, 0)),
            pl.BlockSpec((1, O_pad), lambda i: (0, 0)),
        ],
        out_specs=pl.BlockSpec((batch_tile, O_pad), lambda i: (i, 0)),
        compiler_params=pltpu.CompilerParams(
            dimension_semantics=("parallel",)),
        cost_estimate=cost,
    )(x, w1_p, b1_p, w2_p, b2_p)
    return out_padded if return_padded else out_padded[:, :O]


def reference_forward_bf16(x, w1, b1, w2, b2):
    # Same numerics as the kernel: bf16 matmul operands, f32 accumulation/epilogue.
    h = jnp.dot(x.astype(jnp.bfloat16), w1.astype(jnp.bfloat16),
                preferred_element_type=jnp.float32) + b1
    h = jax.nn.sigmoid(h)
    return jnp.dot(h.astype(jnp.bfloat16), w2.astype(jnp.bfloat16),
                   preferred_element_type=jnp.float32) + b2


def reference_forward_f32(x, w1, b1, w2, b2):
    h = jax.nn.sigmoid(x @ w1 + b1)
    return h @ w2 + b2


if __name__ == "__main__":
    key = jax.random.PRNGKey(0)
    kx, k1, kb1, k2, kb2 = jax.random.split(key, 5)

    B, IN, HID, OUT = 8, 784, 128, 10

    x = jax.random.normal(kx, (B, IN), dtype=jnp.float32)
    # PyTorch-like uniform Linear init scale.
    bound1 = 1.0 / (IN ** 0.5)
    w1 = jax.random.uniform(k1, (IN, HID), jnp.float32, -bound1, bound1)
    b1 = jax.random.uniform(kb1, (HID,), jnp.float32, -bound1, bound1)
    bound2 = 1.0 / (HID ** 0.5)
    w2 = jax.random.uniform(k2, (HID, OUT), jnp.float32, -bound2, bound2)
    b2 = jax.random.uniform(kb2, (OUT,), jnp.float32, -bound2, bound2)

    fwd = jax.jit(mlp_forward)

    # Small-batch (no-grid, latency) path.
    out = fwd(x, w1, b1, w2, b2)
    jax.block_until_ready(out)
    assert out.shape == (B, OUT)
    assert jnp.allclose(out, reference_forward_bf16(x, w1, b1, w2, b2),
                        atol=2e-3, rtol=2e-3)
    assert jnp.allclose(out, reference_forward_f32(x, w1, b1, w2, b2),
                        atol=3e-2, rtol=3e-2)

    # Large-batch (weight-stationary, batch-tiled, parallel) path with a
    # ragged last block (2560 = 2 full 1024-row tiles + one 512-row tile).
    BL = 2560
    xl = jax.random.normal(kx, (BL, IN), dtype=jnp.float32)
    outl = fwd(xl, w1, b1, w2, b2)
    jax.block_until_ready(outl)
    assert outl.shape == (BL, OUT)
    assert jnp.allclose(outl, reference_forward_bf16(xl, w1, b1, w2, b2),
                        atol=2e-3, rtol=2e-3)

    # Padded-slab option for fusion-friendly downstream consumers.
    outp = jax.jit(lambda *a: mlp_forward(*a, return_padded=True))(x, w1, b1, w2, b2)
    jax.block_until_ready(outp)
    assert outp.shape == (B, 128)
    assert jnp.allclose(outp[:, OUT:], 0.0)

    print("KERNEL_OK")
</pallas_src>

<mosaic_0001>
module attributes {stable_mosaic.version = 11 : i64} {
  func.func @mlp_kernel(%arg0: memref<8x784xf32, #tpu.memory_space<vmem>>, %arg1: memref<784x128xbf16, #tpu.memory_space<vmem>>, %arg2: memref<1x128xf32, #tpu.memory_space<vmem>>, %arg3: memref<128x128xbf16, #tpu.memory_space<vmem>>, %arg4: memref<1x128xf32, #tpu.memory_space<vmem>>, %arg5: memref<8x128xf32, #tpu.memory_space<vmem>>) attributes {dimension_semantics = [], scalar_prefetch = 0 : i64, scratch_operands = 0 : i64, tpu.core_type = #tpu.core_type<tc>} {
    %c0 = arith.constant 0 : index
    %c0_0 = arith.constant 0 : index
    %0 = vector.load %arg0[%c0, %c0_0] : memref<8x784xf32, #tpu.memory_space<vmem>>, vector<8x784xf32>
    %1 = arith.truncf %0 : vector<8x784xf32> to vector<8x784xbf16>
    %c0_1 = arith.constant 0 : index
    %c0_2 = arith.constant 0 : index
    %2 = vector.load %arg1[%c0_1, %c0_2] : memref<784x128xbf16, #tpu.memory_space<vmem>>, vector<784x128xbf16>
    %cst = arith.constant dense<0.000000e+00> : vector<8x128xf32>
    %3 = tpu.matmul %1, %2, %cst {dimension_numbers = #tpu.dot_dimension_numbers<[1], [0], [0], [1], [0, 0, 1, 1], [], []>} : vector<8x784xbf16>, vector<784x128xbf16>, vector<8x128xf32> -> vector<8x128xf32>
    %c0_3 = arith.constant 0 : index
    %c0_4 = arith.constant 0 : index
    %4 = vector.load %arg2[%c0_3, %c0_4] : memref<1x128xf32, #tpu.memory_space<vmem>>, vector<1x128xf32>
    %5 = vector.broadcast %4 : vector<1x128xf32> to vector<8x128xf32>
    %6 = arith.addf %3, %5 : vector<8x128xf32>
    %7 = arith.negf %6 : vector<8x128xf32>
    %8 = math.exp %7 : vector<8x128xf32>
    %cst_5 = arith.constant 1.000000e+00 : f32
    %9 = vector.broadcast %cst_5 : f32 to vector<8x128xf32>
    %10 = arith.addf %9, %8 : vector<8x128xf32>
    %11 = arith.divf %9, %10 : vector<8x128xf32>
    %12 = arith.truncf %11 : vector<8x128xf32> to vector<8x128xbf16>
    %c0_6 = arith.constant 0 : index
    %c0_7 = arith.constant 0 : index
    %13 = vector.load %arg3[%c0_6, %c0_7] : memref<128x128xbf16, #tpu.memory_space<vmem>>, vector<128x128xbf16>
    %cst_8 = arith.constant dense<0.000000e+00> : vector<8x128xf32>
    %14 = tpu.matmul %12, %13, %cst_8 {dimension_numbers = #tpu.dot_dimension_numbers<[1], [0], [0], [1], [0, 0, 1, 1], [], []>} : vector<8x128xbf16>, vector<128x128xbf16>, vector<8x128xf32> -> vector<8x128xf32>
    %c0_9 = arith.constant 0 : index
    %c0_10 = arith.constant 0 : index
    %15 = vector.load %arg4[%c0_9, %c0_10] : memref<1x128xf32, #tpu.memory_space<vmem>>, vector<1x128xf32>
    %16 = vector.broadcast %15 : vector<1x128xf32> to vector<8x128xf32>
    %17 = arith.addf %14, %16 : vector<8x128xf32>
    %c0_11 = arith.constant 0 : index
    %c0_12 = arith.constant 0 : index
    %18 = vector.load %arg5[%c0_11, %c0_12] : memref<8x128xf32, #tpu.memory_space<vmem>>, vector<8x128xf32>
    tpu.vector_store %arg5[%c0_11, %c0_12], %17 {strides = array<i32>} : memref<8x128xf32, #tpu.memory_space<vmem>>, vector<8x128xf32>,
    return
  }
}

</mosaic_0001>

<bundles_post_ra>
// kernel: mlp_forward.1
= control target key start
LH: loop header
LB: loop body
LE: loop exit
PB: predicated region body
PF: predicated region fallthrough
CT: control target
= control target key end

     0   :  { %s1197_s0 = inlined_call_operand.vmem [shape: f32[8,784], index: 0, kind: input, shape index: {}]   ;;  %s1198_s1 = inlined_call_operand.vmem [shape: bf16[784,128], index: 1, kind: input, shape index: {}]   ;;  %s1199_s2 = inlined_call_operand.vmem [shape: f32[1,128], index: 2, kind: input, shape index: {}]   ;;  %s1200_s3 = inlined_call_operand.vmem [shape: bf16[128,128], index: 3, kind: input, shape index: {}]   ;;  %s1201_s4 = inlined_call_operand.vmem [shape: f32[1,128], index: 4, kind: input, shape index: {}]   ;;  %s1202_s5 = inlined_call_operand.hbm [shape: f32[8,128], index: 5, kind: output, shape index: {}]  }
   0x1   :  { %v882_v0 = vld [vmem:[%s1198_s1 + $0x38] sm:$0xff]  ;;  %v881_v3 = vld [vmem:[%s1198_s1 + $0x30] sm:$0xff]  ;;  %v880_v8 = vld [vmem:[%s1198_s1 + $0x28] sm:$0xff] }
   0x2   :  { %v890_v1 = vld [vmem:[%s1198_s1 + $0x78] sm:$0xff]  ;;  %436 = vmatpush.bf16.msra.mxu0 %v882_v0  ;;  %v889_v4 = vld [vmem:[%s1198_s1 + $0x70] sm:$0xff]  ;;  %v888_v9 = vld [vmem:[%s1198_s1 + $0x68] sm:$0xff] }
   0x3   :  { %v898_v2 = vld [vmem:[%s1198_s1 + $0xb8] sm:$0xff]  ;;  %449 = vmatpush.bf16.msra.mxu1 %v890_v1  ;;  %v897_v5 = vld [vmem:[%s1198_s1 + $0xb0] sm:$0xff]  ;;  %v896_v10 = vld [vmem:[%s1198_s1 + $0xa8] sm:$0xff] }
   0x4   :  { %462 = vmatpush.bf16.msra.mxu2 %v898_v2  ;;  %v906_v6 = vld [vmem:[%s1198_s1 + $0xf8] sm:$0xff]  ;;  %v905_v7 = vld [vmem:[%s1198_s1 + $0xf0] sm:$0xff]  ;;  %v904_v11 = vld [vmem:[%s1198_s1 + $0xe8] sm:$0xff] }
   0x5   :  { %475 = vmatpush.bf16.msra.mxu3 %v906_v6  ;;  %v879_v12 = vld [vmem:[%s1198_s1 + $0x20] sm:$0xff]  ;;  %v878_v16 = vld [vmem:[%s1198_s1 + $0x18] sm:$0xff] }
   0x6   :  { %437 = vmatpush.bf16.msra.mxu0 %v881_v3  ;;  %v887_v13 = vld [vmem:[%s1198_s1 + $0x60] sm:$0xff]  ;;  %v886_v17 = vld [vmem:[%s1198_s1 + $0x58] sm:$0xff] }
   0x7   :  { %450 = vmatpush.bf16.msra.mxu1 %v889_v4  ;;  %v895_v14 = vld [vmem:[%s1198_s1 + $0xa0] sm:$0xff]  ;;  %v894_v18 = vld [vmem:[%s1198_s1 + $0x98] sm:$0xff] }
   0x8   :  { %463 = vmatpush.bf16.msra.mxu2 %v897_v5  ;;  %v903_v15 = vld [vmem:[%s1198_s1 + $0xe0] sm:$0xff] }
   0x9   :  { %476 = vmatpush.bf16.msra.mxu3 %v905_v7 }
   0xa   :  { %438 = vmatpush.bf16.msra.mxu0 %v880_v8 }
   0xb   :  { %451 = vmatpush.bf16.msra.mxu1 %v888_v9 }
   0xc   :  { %464 = vmatpush.bf16.msra.mxu2 %v896_v10 }
   0xd   :  { %477 = vmatpush.bf16.msra.mxu3 %v904_v11 }
   0xe   :  { %439 = vmatpush.bf16.msra.mxu0 %v879_v12 }
   0xf   :  { %452 = vmatpush.bf16.msra.mxu1 %v887_v13 }
  0x10   :  { %465 = vmatpush.bf16.msra.mxu2 %v895_v14 }
  0x11   :  { %10 = vsyncpa [#allocation3], 0  ;;  %478 = vmatpush.bf16.msra.mxu3 %v903_v15  ;;  %v902_v19 = vld [vmem:[%s1198_s1 + $0xd8] sm:$0xff]  ;;  %v877_v20 = vld [vmem:[%s1198_s1 + $0x10] sm:$0xff]  ;;  %vm432_vm0 = vcmask 130048   ;;  %s965_s21 = smov [#allocation2]  }
  0x12   :  { %440 = vmatpush.bf16.msra.mxu0 %v878_v16  ;;  %v885_v21 = vld [vmem:[%s1198_s1 + $0x50] sm:$0xff]  ;;  %v876_v24 = vld [vmem:[%s1198_s1 + $0x8] sm:$0xff]  ;;  %v875_v27 = vld [vmem:[%s1198_s1] sm:$0xff]  ;;  %s634_s22 = sshll.u32 %s965_s21, 4  ;;  %s636_s25 = sshll.u32 %s1202_s5, 4  ;;  %s635_s22 = int_to_ptr.vmem [resolvable:$true] %s634_s22  ;;  %s637_s25 = int_to_ptr.hbm [resolvable:$true] %s636_s25 }
  0x13   :  { %453 = vmatpush.bf16.msra.mxu1 %v886_v17  ;;  %v893_v22 = vld [vmem:[%s1198_s1 + $0x90] sm:$0xff]  ;;  %v884_v25 = vld [vmem:[%s1198_s1 + $0x48] sm:$0xff]  ;;  %v883_v29 = vld [vmem:[%s1198_s1 + $0x40] sm:$0xff] }
  0x14   :  { %466 = vmatpush.bf16.msra.mxu2 %v894_v18  ;;  %v901_v23 = vld [vmem:[%s1198_s1 + $0xd0] sm:$0xff]  ;;  %v892_v26 = vld [vmem:[%s1198_s1 + $0x88] sm:$0xff]  ;;  %v22_v30 = vld [vmem:[%s1197_s0] sm:$0xff] }
  0x15   :  { %479 = vmatpush.bf16.msra.mxu3 %v902_v19  ;;  %v900_v28 = vld [vmem:[%s1198_s1 + $0xc8] sm:$0xff]  ;;  %v914_v32 = vld [vmem:[%s1198_s1 + $0x138] sm:$0xff]  ;;  %v891_v34 = vld [vmem:[%s1198_s1 + $0x80] sm:$0xff]  ;;  %v29_v36 = vpack.c.bf16 %v22_v30, %v22_v30 }
  0x16   :  { %441 = vmatpush.bf16.msra.mxu0 %v877_v20  ;;  %v23_v31 = vld [vmem:[%s1197_s0 + $0x8] sm:$0xff]  ;;  %v922_v33 = vld [vmem:[%s1198_s1 + $0x178] sm:$0xff]  ;;  %v24_v35 = vld [vmem:[%s1197_s0 + $0x10] sm:$0xff] }
  0x17   :  { %454 = vmatpush.bf16.msra.mxu1 %v885_v21  ;;  %v30_v37 = vpack.c.bf16 %v23_v31, %v23_v31  ;;  %v899_v38 = vld [vmem:[%s1198_s1 + $0xc0] sm:$0xff]  ;;  %v25_v40 = vld [vmem:[%s1197_s0 + $0x18] sm:$0xff]  ;;  %v913_v41 = vld [vmem:[%s1198_s1 + $0x130] sm:$0xff]  ;;  %v31_v43 = vpack.c.bf16 %v24_v35, %v24_v35 }
  0x18   :  { %467 = vmatpush.bf16.msra.mxu2 %v893_v22  ;;  %v923_v39 = vld [vmem:[%s1198_s1 + $0x180] sm:$0xff]  ;;  %v921_v42 = vld [vmem:[%s1198_s1 + $0x170] sm:$0xff]  ;;  %v32_v44 = vpack.c.bf16 %v25_v40, %v25_v40  ;;  %v912_v45 = vld [vmem:[%s1198_s1 + $0x128] sm:$0xff] }
  0x19   :  { %480 = vmatpush.bf16.msra.mxu3 %v901_v23  ;;  %v920_v46 = vld [vmem:[%s1198_s1 + $0x168] sm:$0xff]  ;;  %v911_v47 = vld [vmem:[%s1198_s1 + $0x120] sm:$0xff]  ;;  %v910_v49 = vld [vmem:[%s1198_s1 + $0x118] sm:$0xff] }
  0x1a   :  { %442 = vmatpush.bf16.msra.mxu0 %v876_v24  ;;  %v919_v48 = vld [vmem:[%s1198_s1 + $0x160] sm:$0xff]  ;;  %v918_v50 = vld [vmem:[%s1198_s1 + $0x158] sm:$0xff]  ;;  %v28_v51 = vld [vmem:[%s1197_s0 + $0x30] sm:$0xff] }
  0x1b   :  { %455 = vmatpush.bf16.msra.mxu1 %v884_v25  ;;  %v909_v52 = vld [vmem:[%s1198_s1 + $0x110] sm:$0xff]  ;;  %v35_v54 = vpack.c.bf16 %v28_v51, %v28_v51  ;;  %v908_v55 = vld [vmem:[%s1198_s1 + $0x108] sm:$0xff]  ;;  %v907_v57 = vld [vmem:[%s1198_s1 + $0x100] sm:$0xff] }
  0x1c   :  { %468 = vmatpush.bf16.msra.mxu2 %v892_v26  ;;  %v917_v53 = vld [vmem:[%s1198_s1 + $0x150] sm:$0xff]  ;;  %v916_v56 = vld [vmem:[%s1198_s1 + $0x148] sm:$0xff]  ;;  %v915_v58 = vld [vmem:[%s1198_s1 + $0x140] sm:$0xff] }
  0x1d   :  { %481 = vmatpush.bf16.msra.mxu3 %v900_v28  ;;  %v26_v59 = vld [vmem:[%s1197_s0 + $0x20] sm:$0xff]  ;;  %v27_v60 = vld [vmem:[%s1197_s0 + $0x28] sm:$0xff]  ;;  %v931_v1 = vld [vmem:[%s1200_s3 + $0x38] sm:$0xff] }
  0x1e   :  { %443 = vmatpush.bf16.msra.mxu0 %v875_v27  ;;  %v33_v61 = vpack.c.bf16 %v26_v59, %v26_v59  ;;  %v34_v62 = vpack.c.bf16 %v27_v60, %v27_v60  ;;  %v930_v2 = vld [vmem:[%s1200_s3 + $0x30] sm:$0xff]  ;;  %v929_v6 = vld [vmem:[%s1200_s3 + $0x28] sm:$0xff]  ;;  %v933_v8 = vld [vmem:[%s1199_s2] ss:$0 sm:$0xff] }
  0x1f   :  { %456 = vmatpush.bf16.msra.mxu1 %v883_v29  ;;  %v928_v9 = vld [vmem:[%s1200_s3 + $0x20] sm:$0xff]  ;;  %v927_v10 = vld [vmem:[%s1200_s3 + $0x18] sm:$0xff]  ;;  %v926_v14 = vld [vmem:[%s1200_s3 + $0x10] sm:$0xff] }
  0x20   :  { %469 = vmatpush.bf16.msra.mxu2 %v891_v34  ;;  %v925_v16 = vld [vmem:[%s1200_s3 + $0x8] sm:$0xff]  ;;  %v924_v19 = vld [vmem:[%s1200_s3] sm:$0xff] }
  0x21   :  { %444 = vmatmul.bf16.vlgmr.msra.gmra.mxu0 %v29_v36  ;;  %482 = vmatpush.bf16.msra.mxu3 %v899_v38 }
  0x22   :  { %488 = vmatpush.bf16.msrb.mxu0 %v914_v32  ;;  %457 = vmatmul.bf16.vlgmr.msra.gmra.mxu1 %v30_v37 }
  0x23   :  { %501 = vmatpush.bf16.msrb.mxu1 %v922_v33  ;;  %470 = vmatmul.bf16.vlgmr.msra.gmra.mxu2 %v31_v43  ;;  %v934_v43 = vld [vmem:[%s1201_s4] ss:$0 sm:$0xff] }
  0x24   :  { %521 = vmatpush.bf16.msrb.mxu2 %v923_v39  ;;  %483 = vmatmul.bf16.vlgmr.msra.gmra.mxu3 %v32_v44 }
  0x25   :  { %615 = vmatpush.bf16.msrb.mxu3 %v931_v1 }
  0x26   :  { %489 = vmatpush.bf16.msrb.mxu0 %v913_v41 }
  0x27   :  { %502 = vmatpush.bf16.msrb.mxu1 %v921_v42 }
  0x29   :  { %616 = vmatpush.bf16.msrb.mxu3 %v930_v2 }
  0x2a   :  { %490 = vmatpush.bf16.msrb.mxu0 %v912_v45 }
  0x2b   :  { %503 = vmatpush.bf16.msrb.mxu1 %v920_v46 }
  0x2d   :  { %617 = vmatpush.bf16.msrb.mxu3 %v929_v6 }
  0x2e   :  { %491 = vmatpush.bf16.msrb.mxu0 %v911_v47 }
  0x2f   :  { %504 = vmatpush.bf16.msrb.mxu1 %v919_v48 }
  0x31   :  { %618 = vmatpush.bf16.msrb.mxu3 %v928_v9 }
  0x32   :  { %492 = vmatpush.bf16.msrb.mxu0 %v910_v49 }
  0x33   :  { %505 = vmatpush.bf16.msrb.mxu1 %v918_v50  ;;  %841 = vmatmul.msk.bf16.vlgmr.msrb.gmra.mxu2 %vm432_vm0, %v35_v54 }
  0x35   :  { %619 = vmatpush.bf16.msrb.mxu3 %v927_v10 }
  0x36   :  { %493 = vmatpush.bf16.msrb.mxu0 %v909_v52 }
  0x37   :  { %506 = vmatpush.bf16.msrb.mxu1 %v917_v53 }
  0x39   :  { %620 = vmatpush.bf16.msrb.mxu3 %v926_v14 }
  0x3a   :  { %494 = vmatpush.bf16.msrb.mxu0 %v908_v55 }
  0x3b   :  { %507 = vmatpush.bf16.msrb.mxu1 %v916_v56 }
  0x3d   :  { %621 = vmatpush.bf16.msrb.mxu3 %v925_v16 }
  0x3e   :  { %495 = vmatpush.bf16.msrb.mxu0 %v907_v57 }
  0x3f   :  { %508 = vmatpush.bf16.msrb.mxu1 %v915_v58 }
  0x41   :  { %496 = vmatmul.bf16.vlgmr.msrb.gmra.mxu0 %v33_v61  ;;  %622 = vmatpush.bf16.msrb.mxu3 %v924_v19 }
  0x42   :  { %509 = vmatmul.bf16.vlgmr.msrb.gmra.mxu1 %v34_v62 }
  0x9e   :  { %v445_v63 = vpop.f32.mrf.mxu0 }
  0x9f   :  { %v458_v0 = vpop.f32.mrf.mxu1  ;;  %v446_v11 = vadd.f32 %v933_v8, %v445_v63 }
  0xa1   :  { %v459_v15 = vadd.f32 %v458_v0, %v446_v11 }
  0xa6   :  { %v447_v3 = vpop.f32.mrf.mxu0  ;;  %v471_v5 = vpop.f32.mrf.mxu2 }
  0xa7   :  { %v460_v4 = vpop.f32.mrf.mxu1  ;;  %v484_v7 = vpop.f32.mrf.mxu3  ;;  %v472_v17 = vadd.f32 %v471_v5, %v459_v15 }
  0xa9   :  { %v485_v20 = vadd.f32 %v484_v7, %v472_v17 }
  0xae   :  { %v473_v12 = vpop.f32.mrf.mxu2 }
  0xaf   :  { %v486_v13 = vpop.f32.mrf.mxu3 }
  0xb6   :  { %v523_v18 = vpop.f32.mrf.mxu2 }
  0xbe   :  { %v497_v21 = vpop.f32.mrf.mxu0  ;;  %v525_v25 = vpop.f32.mrf.mxu2 }
  0xbf   :  { %v510_v22 = vpop.f32.mrf.mxu1  ;;  %v498_v23 = vadd.f32 %v497_v21, %v485_v20 }
  0xc1   :  { %v511_v24 = vadd.f32 %v510_v22, %v498_v23 }
  0xc3   :  { %v524_v26 = vadd.f32 %v523_v18, %v511_v24 }
  0xc5   :  { %v842_v27 = vmul.f32 -1.442695, %v524_v26 }
  0xc6   :  { %v499_v28 = vpop.f32.mrf.mxu0 }
  0xc7   :  { %v512_v29 = vpop.f32.mrf.mxu1  ;;  %935 = vpow2.f32 %v842_v27 }
  0xcd   :  { %v936_v30 = vpop.eup %935 }
  0xce   :  { %v530_v31 = vadd.f32 1.0, %v936_v30 }
  0xd0   :  { %937 = vrcp.f32 %v530_v31  ;;  %v542_v35 = vand.u32 2147483648, %v530_v31  ;;  %v540_v37 = vand.u32 2147483647, %v530_v31  ;;  %vm536_vm2 = vweird.f32 %v530_v31 }
  0xd2   :  { %v543_v39 = vor.u32 1.1754944e-38, %v542_v35  ;;  %vm541_vm4 = vcmp.eq.f32.partialorder %v540_v37, 8.507059e+37 }
  0xd6   :  { %v938_v32 = vpop.eup %937 }
  0xd7   :  { %v532_v33 = vmul.f32 %v938_v32, %v530_v31  ;;  %vm537_vm1 = vweird.f32 %v938_v32 }
  0xd8   :  { %vm538_vm3 = vmor %vm536_vm2, %vm537_vm1 }
  0xd9   :  { %v533_v34 = vsub.f32 1.0, %v532_v33 }
  0xdb   :  { %v534_v36 = vmul.f32 %v938_v32, %v533_v34 }
  0xdd   :  { %v535_v38 = vadd.f32 %v938_v32, %v534_v36 }
  0xdf   :  { %v539_v40 = vsel %vm538_vm3, %v938_v32, %v535_v38 }
  0xe0   :  { %v544_v41 = vsel %vm541_vm4, %v543_v39, %v539_v40 }
  0xe1   :  { %v546_v42 = vpack.c.bf16 %v544_v41, %v544_v41 }
  0xe3   :  { %623 = vmatmul.bf16.vlgmr.msrb.gmra.mxu3 %v546_v42 }
 0x166   :  { %v624_v44 = vpop.f32.mrf.mxu3 }
 0x167   :  { %v625_v45 = vadd.f32 %v934_v43, %v624_v44 }
 0x169   :  { %628 = vst [vmem:[#allocation2] sm:$0xff] %v625_v45 }
 0x16a   :  { %639 = dma.vmem_to_hbm [thread:$0]  %s635_s22, 128, %s637_s25, [#allocation3]  }
 0x16e   :  { %v626_v46 = vpop.f32.mrf.mxu3 }
 0x16f   :  { %963 = dma.done.wait [#allocation3], 128  }
 0x170   :  { %964 = vsyncadd [#allocation3], 4294967168 }
 0x171   :  { %644 = vsyncpa [#allocation3], 1 }

</bundles_post_ra>
